<compile_context>
chip_gen: v5e
topology: v5e:2x2
jax: 0.10.0
libtpu: 0.0.40
codegen_flags: <defaults>
</compile_context>

<pallas_src>
import functools

import jax
import jax.numpy as jnp
from jax.experimental import pallas as pl
from jax.experimental.pallas import tpu as pltpu


def _gram_kernel(x_ref, o_ref, *, kernel_name: str, neg_gamma: float):
    """One grid step = TM models of the model-batch.

    x_ref: VMEM (TM, BS, D) features, native dtype (bf16 kept bf16 for the MXU)
    o_ref: VMEM (TM, BS, BS) gram output block, f32
    """
    x = x_ref[...]
    # Batched MXU matmul contracting the last dim of both operands (no explicit
    # transpose / (D, BS) VMEM copy); f32 accumulation regardless of input dtype.
    g = jnp.einsum("mik,mjk->mij", x, x, preferred_element_type=jnp.float32)

    if kernel_name == "linear":
        out = g
    else:  # rbf
        bs = g.shape[-1]
        rows = jax.lax.broadcasted_iota(jnp.int32, (1, bs, bs), 1)
        cols = jax.lax.broadcasted_iota(jnp.int32, (1, bs, bs), 2)
        diag = jnp.where(rows == cols, g, 0.0)
        # ||x_i||^2 from the Gram diagonal; two reductions (lane + sublane) avoid
        # transposing the (BS, 1) column into a (1, BS) row.
        sq_col = jnp.sum(diag, axis=-1, keepdims=True)    # (TM, BS, 1)
        sq_row = jnp.sum(diag, axis=-2, keepdims=True)    # (TM, 1, BS)
        d2 = jnp.maximum(sq_col + sq_row - 2.0 * g, 0.0)
        out = jnp.exp(d2 * neg_gamma)                     # neg_gamma folded at trace time

    o_ref[...] = out.astype(o_ref.dtype)


_VMEM_STEP_BUDGET = 24 * 1024 * 1024   # target per-grid-step working set
_VMEM_LIMIT = 48 * 1024 * 1024         # safely under v7x's 64 MiB physical VMEM


def _pick_models_per_step(mbs: int, bs: int, d: int, in_itemsize: int) -> int:
    """Largest divisor of mbs whose (double-buffered) working set fits the budget."""
    def step_bytes(tm):
        io = tm * (bs * d * in_itemsize + bs * bs * 4)   # input + output tiles
        inter = tm * 3 * bs * bs * 4                     # g / d2 / out f32 temporaries
        return 2 * io + inter                            # x2: pipeline double buffering
    tm = 1
    for cand in range(mbs, 0, -1):
        if mbs % cand == 0 and step_bytes(cand) <= _VMEM_STEP_BUDGET:
            tm = cand
            break
    return tm


def batched_gram_pallas(feats: jnp.ndarray, *, kernel_name: str, param: float) -> jnp.ndarray:
    """feats: (MBS, BS, D) -> gram: (MBS, BS, BS), float32."""
    if kernel_name not in ("linear", "rbf"):
        raise ValueError(f"kernel {kernel_name} not implemented")
    mbs, bs, d = feats.shape
    itemsize = jnp.dtype(feats.dtype).itemsize
    tm = _pick_models_per_step(mbs, bs, d, itemsize)

    neg_gamma = 0.0
    if kernel_name == "rbf":
        sigma = float(param)
        neg_gamma = -1.0 / (2.0 * sigma * sigma)

    kernel_fn = functools.partial(_gram_kernel, kernel_name=kernel_name,
                                  neg_gamma=neg_gamma)

    cost = pl.CostEstimate(
        flops=2 * mbs * bs * bs * d,
        transcendentals=(mbs * bs * bs) if kernel_name == "rbf" else 0,
        bytes_accessed=mbs * (bs * d * itemsize + bs * bs * 4),
    )

    return pl.pallas_call(
        kernel_fn,
        out_shape=jax.ShapeDtypeStruct((mbs, bs, bs), jnp.float32),
        grid_spec=pltpu.PrefetchScalarGridSpec(
            num_scalar_prefetch=0,
            grid=(mbs // tm,),
            in_specs=[pl.BlockSpec((tm, bs, d), lambda m: (m, 0, 0))],
            out_specs=pl.BlockSpec((tm, bs, bs), lambda m: (m, 0, 0)),
        ),
        compiler_params=pltpu.CompilerParams(
            dimension_semantics=("parallel",),   # model axis shards across TCs on v7x
            vmem_limit_bytes=_VMEM_LIMIT,
        ),
        cost_estimate=cost,
    )(feats)


class FeatureKernelPallas:
    """JAX/Pallas port of FeatureKernel (forward pass only)."""

    # Deterministic default parameters (mirrors KERN_PARAMS defaults).
    _KERN_PARAMS = {"rbf": {"param": 1.0}, "linear": {}}

    def __init__(self, kernel: str = "rbf", detach_diag: bool = False,
                 readd_diag: bool = True, params: dict = None,
                 learnable: bool = False):
        assert kernel in ("rbf", "linear"), \
            f"Kernel {kernel} not found (only 'rbf'/'linear' implemented here)"
        self.kernel = kernel
        self.detach_diag = detach_diag      # autograd-only; no forward effect
        self.readd = readd_diag             # autograd-only; no forward effect
        self.params = dict(self._KERN_PARAMS.get(kernel, {}))
        if params is not None:
            self.params.update(params)

    def batched_kernel(self, feats: jnp.ndarray, flat_second: bool = True) -> jnp.ndarray:
        if feats.ndim < (3 if flat_second else 2):
            raise RuntimeError("Features must have at least 2/3 dimensions")
        if flat_second:
            mbs, bs = feats.shape[:2]
            feats = feats.reshape(mbs, bs, -1)
        else:
            mbs = feats.shape[0]
            feats = feats.reshape(mbs, -1)
        single = False
        if feats.ndim == 2:
            feats = feats[None]
            single = True
        param = float(self.params.get("param", 1.0))
        gram = batched_gram_pallas(feats, kernel_name=self.kernel, param=param)
        if single:
            gram = gram[0]
        return gram

    def forward(self, params, feats, preds, track, layer=None):
        return self.batched_kernel(feats)

    def __call__(self, *args, **kwargs):
        return self.forward(*args, **kwargs)


class FunctionKernelPallas(FeatureKernelPallas):
    """JAX/Pallas port of FunctionKernel: Gram over flattened model predictions."""

    def forward(self, params, feats, preds, track, layer=None):
        return self.batched_kernel(preds, flat_second=False)


def _reference_gram(x3d, kernel_name, param):
    x = x3d.astype(jnp.float32)
    g = jnp.einsum("mik,mjk->mij", x, x)
    if kernel_name == "linear":
        return g
    sq = jnp.sum(x * x, axis=-1)
    d2 = jnp.maximum(sq[:, :, None] + sq[:, None, :] - 2.0 * g, 0.0)
    return jnp.exp(-d2 / (2.0 * float(param) ** 2))


if __name__ == "__main__":
    key = jax.random.PRNGKey(0)
    k1, k2 = jax.random.split(key)

    # FunctionKernel operates on model predictions: (model_bs, bs, num_classes).
    model_bs, bs, num_classes = 4, 8, 16
    preds = jax.random.normal(k1, (model_bs, bs, num_classes), dtype=jnp.float32)

    mod = FunctionKernelPallas(kernel="rbf", params={"param": 8.0})
    gram = jax.block_until_ready(mod(None, None, preds, None))
    assert gram.shape == (model_bs, model_bs), gram.shape

    preds_flat = preds.reshape(1, model_bs, -1)
    ref = _reference_gram(preds_flat, "rbf", 8.0)[0]
    assert jnp.allclose(gram, ref, atol=1e-4, rtol=1e-4), \
        float(jnp.max(jnp.abs(gram - ref)))

    # linear function-space kernel
    mod_lin = FunctionKernelPallas(kernel="linear")
    gram_lin = jax.block_until_ready(mod_lin(None, None, preds, None))
    ref_lin = _reference_gram(preds_flat, "linear", 1.0)[0]
    assert jnp.allclose(gram_lin, ref_lin, atol=1e-4, rtol=1e-4), \
        float(jnp.max(jnp.abs(gram_lin - ref_lin)))

    # inherited FeatureKernel path (flat_second=True, multi-model grid batching)
    feats = jax.random.normal(k2, (4, 16, 8, 8), dtype=jnp.float32)   # D = 64
    mod_feat = FeatureKernelPallas(kernel="rbf", params={"param": 4.0})
    gram_f = jax.block_until_ready(mod_feat(None, feats, None, None))
    ref_f = _reference_gram(feats.reshape(4, 16, -1), "rbf", 4.0)
    assert gram_f.shape == (4, 16, 16), gram_f.shape
    assert jnp.allclose(gram_f, ref_f, atol=1e-4, rtol=1e-4), \
        float(jnp.max(jnp.abs(gram_f - ref_f)))

    print("KERNEL_OK")
</pallas_src>

<mosaic_0001>
module attributes {stable_mosaic.version = 11 : i64} {
  func.func @_gram_kernel(%arg0: i32, %arg1: memref<1x4x128xf32, #tpu.memory_space<vmem>>, %arg2: memref<1x4x4xf32, #tpu.memory_space<vmem>>) attributes {dimension_semantics = [#tpu.dimension_semantics<parallel>], iteration_bounds = array<i64: 1>, scalar_prefetch = 0 : i64, scratch_operands = 0 : i64, tpu.core_type = #tpu.core_type<tc>, window_params = [{transform_indices = @transform_0, window_bounds = array<i64: 1, 4, 128>}, {transform_indices = @transform_1, window_bounds = array<i64: 1, 4, 4>}]} {
    %c0 = arith.constant 0 : index
    %c0_0 = arith.constant 0 : index
    %c0_1 = arith.constant 0 : index
    %0 = vector.load %arg1[%c0, %c0_0, %c0_1] : memref<1x4x128xf32, #tpu.memory_space<vmem>>, vector<1x4x128xf32>
    "tpu.trace_start"() <{level = 10 : i32, message = "mik,mjk->mij"}> : () -> ()
    %cst = arith.constant dense<0.000000e+00> : vector<1x4x4xf32>
    %1 = tpu.matmul %0, %0, %cst {dimension_numbers = #tpu.dot_dimension_numbers<[2], [2], [1], [1], [0, 0, 0, 1, 1, 1], [0], [0]>} : vector<1x4x128xf32>, vector<1x4x128xf32>, vector<1x4x4xf32> -> vector<1x4x4xf32>
    "tpu.trace_stop"() : () -> ()
    %2 = tpu.iota {dimensions = array<i32: 1>} : vector<1x4x4xi32>
    %3 = tpu.iota {dimensions = array<i32: 2>} : vector<1x4x4xi32>
    %4 = arith.cmpi eq, %2, %3 : vector<1x4x4xi32>
    %cst_2 = arith.constant 0.000000e+00 : f32
    %5 = vector.broadcast %cst_2 : f32 to vector<1x4x4xf32>
    %6 = arith.select %4, %1, %5 : vector<1x4x4xi1>, vector<1x4x4xf32>
    %cst_3 = arith.constant dense<0.000000e+00> : vector<1x4xf32>
    %7 = vector.multi_reduction <add>, %6, %cst_3 [2] : vector<1x4x4xf32> to vector<1x4xf32>
    %8 = vector.shape_cast %7 : vector<1x4xf32> to vector<1x4x1xf32>
    %cst_4 = arith.constant dense<0.000000e+00> : vector<1x4xf32>
    %9 = vector.multi_reduction <add>, %6, %cst_4 [1] : vector<1x4x4xf32> to vector<1x4xf32>
    %10 = vector.shape_cast %9 : vector<1x4xf32> to vector<1x1x4xf32>
    %11 = vector.broadcast %8 : vector<1x4x1xf32> to vector<1x4x4xf32>
    %12 = vector.broadcast %10 : vector<1x1x4xf32> to vector<1x4x4xf32>
    %13 = arith.addf %11, %12 : vector<1x4x4xf32>
    %cst_5 = arith.constant 2.000000e+00 : f32
    %14 = vector.broadcast %cst_5 : f32 to vector<1x4x4xf32>
    %15 = arith.mulf %14, %1 : vector<1x4x4xf32>
    %16 = arith.subf %13, %15 : vector<1x4x4xf32>
    %cst_6 = arith.constant 0.000000e+00 : f32
    %17 = vector.broadcast %cst_6 : f32 to vector<1x4x4xf32>
    %18 = arith.maximumf %16, %17 : vector<1x4x4xf32>
    %cst_7 = arith.constant -7.812500e-03 : f32
    %19 = vector.broadcast %cst_7 : f32 to vector<1x4x4xf32>
    %20 = arith.mulf %18, %19 : vector<1x4x4xf32>
    %21 = math.exp %20 : vector<1x4x4xf32>
    %c0_8 = arith.constant 0 : index
    %c0_9 = arith.constant 0 : index
    %c0_10 = arith.constant 0 : index
    %22 = vector.load %arg2[%c0_8, %c0_9, %c0_10] : memref<1x4x4xf32, #tpu.memory_space<vmem>>, vector<1x4x4xf32>
    tpu.vector_store %arg2[%c0_8, %c0_9, %c0_10], %21 {strides = array<i32>} : memref<1x4x4xf32, #tpu.memory_space<vmem>>, vector<1x4x4xf32>,
    return
  }
  func.func @transform_0(%arg0: i32) -> (i32, i32, i32) {
    %c0_i32 = arith.constant 0 : i32
    %c0_i32_0 = arith.constant 0 : i32
    %c0_i32_1 = arith.constant 0 : i32
    return %arg0, %c0_i32, %c0_i32_0 : i32, i32, i32
  }
  func.func @transform_1(%arg0: i32) -> (i32, i32, i32) {
    %c0_i32 = arith.constant 0 : i32
    %c0_i32_0 = arith.constant 0 : i32
    %c0_i32_1 = arith.constant 0 : i32
    return %arg0, %c0_i32, %c0_i32_0 : i32, i32, i32
  }
}

</mosaic_0001>

<bundles_post_ra>
// kernel: tpu_custom_call.1
= control target key start
LH: loop header
LB: loop body
LE: loop exit
PB: predicated region body
PF: predicated region fallthrough
CT: control target
= control target key end

     0   :  { %6 = vsyncpa [#allocation3], 0  ;;  %s161_s0 = inlined_call_operand.hbm [shape: f32[1,4,128], index: 0, kind: input, shape index: {}]   ;;  %s162_s1 = inlined_call_operand.hbm [shape: f32[1,4,4], index: 1, kind: output, shape index: {}]  }
   0x1   :  { %7 = vsyncpa [#allocation4], 0  ;;  %s13_s8 = sshll.u32 %s161_s0, 4  ;;  %s141_s9 = smov [#allocation2]   ;;  %s14_s8 = int_to_ptr.hbm [resolvable:$true] %s13_s8 }
   0x2   :  { %s15_s10 = sshll.u32 %s141_s9, 4  ;;  %s16_s10 = int_to_ptr.vmem [resolvable:$true] %s15_s10 }
   0x3   :  { %18 = dma.hbm_to_vmem [thread:$0]  %s14_s8, 64, %s16_s10, [#allocation3]  }
   0x4   :  { %137 = dma.done.wait [#allocation3], 64  }
   0x5   :  { %138 = vsyncadd [#allocation3], 4294967232  ;;  %v23_v0 = vld [vmem:[#allocation2] sm:$0xf]  ;;  %v44_v1 = vlaneseq  ;;  %vm50_vm1 = vcmask 27648   ;;  %s142_s0 = smov [#allocation5]  }
   0x6   :  { %39 = vmatpush.xpose.msra.mxu0 %v23_v0  ;;  %s73_s11 = sshll.u32 %s142_s0, 4  ;;  %s75_s14 = sshll.u32 %s162_s1, 4  ;;  %s74_s11 = int_to_ptr.vmem [resolvable:$true] %s73_s11  ;;  %s76_s14 = int_to_ptr.hbm [resolvable:$true] %s75_s14 }
   0x7   :  { %v45_v2 = vshrl.u32 %v44_v1, 7  ;;  %v47_v3 = vand.u32 127, %v44_v1 }
   0x9   :  { %40 = vmatmul.f32.vlgmr.msra.gmra.mxu0 %v23_v0  ;;  %vm48_vm0 = vcmp.eq.s32.totalorder %v45_v2, %v47_v3 }
  0x86   :  { %v41_v4 = vpop.f32.mrf.mxu0 }
  0x87   :  { %v49_v5 = vsel %vm48_vm0, %v41_v4, 0.0  ;;  %v61_v14 = vmul.f32 2.0, %v41_v4 }
  0x88   :  { %v51_v6 = vsel %vm50_vm1, %v49_v5, 0.0 }
  0x89   :  { %52 = vadd.xlane.f32.xlu0 %v51_v6  ;;  %v54_v7 = vrot.slane %v51_v6, 4 }
  0x8b   :  { %v55_v8 = vadd.f32 %v54_v7, %v51_v6 }
  0x8d   :  { %v56_v9 = vrot.slane %v55_v8, 2 }
  0x8f   :  { %v57_v10 = vadd.f32 %v56_v9, %v55_v8 }
  0x91   :  { %v58_v11 = vrot.slane %v57_v10, 1 }
  0x93   :  { %v59_v12 = vadd.f32 %v58_v11, %v57_v10 }
  0xfc   :  { %v53_v13 = vpop.xlane.xlu0 %52 }
  0xfd   :  { %v60_v15 = vadd.f32 %v59_v12, %v53_v13 }
  0xff   :  { %v62_v16 = vsub.f32 %v60_v15, %v61_v14 }
 0x101   :  { %v63_v17 = vmax.f32 %v62_v16, 0.0 }
 0x103   :  { %v64_v18 = vmul.f32 -0.0078125, %v63_v17 }
 0x105   :  { %v65_v19 = vmul.f32 1.442695, %v64_v18 }
 0x107   :  { %87 = vpow2.f32 %v65_v19 }
 0x10d   :  { %v88_v20 = vpop.eup %87 }
 0x10e   :  { %67 = vst.msk [vmem:[#allocation5] sm:$0xf] %vm50_vm1, %v88_v20 }
 0x10f   :  { %78 = dma.vmem_to_hbm [thread:$0]  %s74_s11, 64, %s76_s14, [#allocation4]  }
 0x110   :  { %139 = dma.done.wait [#allocation4], 64  }
 0x111   :  { %140 = vsyncadd [#allocation4], 4294967232 }
 0x112   :  { %83 = vsyncpa [#allocation3], 1 }
 0x113   :  { %84 = vsyncpa [#allocation4], 1 }

</bundles_post_ra>
